<compile_context>
chip_gen: v6e
topology: v6e:2x2x1
jax: 0.10.0
libtpu: 0.0.40
codegen_flags: <defaults>
</compile_context>

<pallas_src>
import jax
import jax.numpy as jnp
import numpy as np
from jax.experimental import pallas as pl
from jax.experimental.pallas import tpu as pltpu


# ---------------------------------------------------------------------------
# Hardware query
# ---------------------------------------------------------------------------
def _vmem_capacity_bytes():
    """Physical per-core VMEM bytes; conservative (v7x) fallback."""
    try:
        cap = int(pltpu.get_tpu_info().vmem_capacity_bytes)
        if cap > 0:
            return cap
    except Exception:
        pass
    return 64 << 20


# ---------------------------------------------------------------------------
# Shared gate math: k=3 zero-padded conv across channels + sigmoid.
# ---------------------------------------------------------------------------
def _gate_from_pooled(y, w0, w1, w2):
    """y: (1, C) f32 pooled means -> (1, C) f32 sigmoid gates."""
    C = y.shape[1]
    idx = jax.lax.broadcasted_iota(jnp.int32, (1, C), 1)
    # Neighbor shifts via XLU rotation; zero the wrapped boundary lanes to
    # emulate the conv's zero padding.
    y_m1 = jnp.where(idx == 0, 0.0, pltpu.roll(y, 1, axis=1))          # y[c-1]
    y_p1 = jnp.where(idx == C - 1, 0.0, pltpu.roll(y, C - 1, axis=1))  # y[c+1]
    return jax.nn.sigmoid(w0 * y_m1 + w1 * y + w2 * y_p1)


# ---------------------------------------------------------------------------
# Fused single-pass kernel: pool + gate + rescale for one batch element.
# ---------------------------------------------------------------------------
def _eca_fused_kernel(w_ref, x_ref, o_ref):
    # w_ref : SMEM (4,) f32 = [w0, w1, w2, 1/(H*W)]
    # x_ref : VMEM (1, C, H*W)  -- lane-dense spatial slab
    # o_ref : VMEM (1, C, H*W)
    w0 = w_ref[0]
    w1 = w_ref[1]
    w2 = w_ref[2]
    inv_hw = w_ref[3]

    # f32-accumulated spatial mean.  x_ref is indexed directly in each
    # consumer so no full-slab temporary is kept live between the two uses.
    y = jnp.sum(x_ref[...], axis=2, dtype=jnp.float32) * inv_hw       # (1, C)
    s = _gate_from_pooled(y, w0, w1, w2)                               # (1, C)
    o_ref[...] = x_ref[...] * s[:, :, None].astype(o_ref.dtype)


# ---------------------------------------------------------------------------
# Two-pass path (very large layers): pass 1 = pooled sums, pass 2 = rescale.
# ---------------------------------------------------------------------------
def _eca_pool_kernel(x_ref, s_ref):
    # grid = (B, n_cb, n_chunks); x_ref: (1, Cb, chunk); s_ref: (1, Cb, 1) f32
    j = pl.program_id(2)

    @pl.when(j == 0)
    def _():
        s_ref[...] = jnp.zeros_like(s_ref)

    s_ref[...] += jnp.sum(x_ref[...], axis=2, keepdims=True, dtype=jnp.float32)


def _eca_scale_kernel(x_ref, g_ref, o_ref):
    # x_ref: (1, C, chunk); g_ref: (1, C, 1) f32
    o_ref[...] = x_ref[...] * g_ref[...].astype(o_ref.dtype)


# ---------------------------------------------------------------------------
# Wrapper.
# ---------------------------------------------------------------------------
def eca_layer(x, conv_weight, *, max_fused_slab_bytes=None,
              donate_input=False, _max_chunk_bytes=8 * 1024 * 1024):
    """ECA forward. x: (B, C, H, W). conv_weight: 3-tap Conv1d weight (no bias)."""
    B, C, H, W = x.shape
    HW = H * W
    dtype_bytes = jnp.dtype(x.dtype).itemsize
    slab_bytes = C * HW * dtype_bytes                     # one batch element

    # Generation-aware scoped-VMEM budget (leave headroom below physical).
    phys = _vmem_capacity_bytes()
    vmem_cap = max(min(phys - (16 << 20), 112 << 20), 24 << 20)

    # Pack conv taps + hoisted 1/(H*W) into one SMEM scalar vector.
    w32 = jnp.asarray(conv_weight, dtype=jnp.float32).reshape(3)
    w = jnp.concatenate([w32, jnp.array([1.0 / float(HW)], dtype=jnp.float32)])

    # Lane-dense layout: spatial dims flattened onto the lane axis.
    x3 = x.reshape(B, C, HW)

    # Fused-path footprint: 2x slab (single-buffered, B==1) or 4x slab
    # (double-buffered across the batch grid).
    single_buf = (B == 1)
    bufs = 2 if single_buf else 4
    hw_fused_limit = (vmem_cap - (2 << 20)) // bufs
    if max_fused_slab_bytes is None:
        fused_limit = hw_fused_limit
    else:
        fused_limit = min(max_fused_slab_bytes, hw_fused_limit)

    if slab_bytes <= fused_limit:
        # ---- Single fused pass: 1 read + 1 write of x (2x HBM traffic) ----
        vmem_limit = int(min(max(bufs * slab_bytes + (4 << 20), 24 << 20),
                             vmem_cap))
        if single_buf:
            x_spec = pl.BlockSpec((1, C, HW), lambda b: (b, 0, 0),
                                  pipeline_mode=pl.Buffered(1))
            o_spec = pl.BlockSpec((1, C, HW), lambda b: (b, 0, 0),
                                  pipeline_mode=pl.Buffered(1))
        else:
            x_spec = pl.BlockSpec((1, C, HW), lambda b: (b, 0, 0))
            o_spec = pl.BlockSpec((1, C, HW), lambda b: (b, 0, 0))

        out3 = pl.pallas_call(
            _eca_fused_kernel,
            out_shape=jax.ShapeDtypeStruct((B, C, HW), x.dtype),
            grid=(B,),
            in_specs=[
                pl.BlockSpec(memory_space=pltpu.MemorySpace.SMEM),   # taps
                x_spec,                                              # x slab
            ],
            out_specs=o_spec,
            compiler_params=pltpu.CompilerParams(
                dimension_semantics=("parallel",),
                vmem_limit_bytes=vmem_limit),
            input_output_aliases={1: 0} if donate_input else {},
        )(w, x3)
        return out3.reshape(B, C, H, W)

    # ---- Two-pass path: pooled sums, then lane-dense tiled rescale --------
    # Chunk budget (explicit vmem limits are set below, so we are not bound
    # by v5e's 16 MiB scoped default).
    max_chunk_bytes = max(min(_max_chunk_bytes, (vmem_cap - (8 << 20)) // 4),
                          128 * C * dtype_bytes)
    max_chunk_elems = max(128, max_chunk_bytes // (C * dtype_bytes))

    hw128 = -(-HW // 128) * 128           # HW rounded up to a lane multiple
    n128 = hw128 // 128
    budget_128 = max(1, max_chunk_elems // 128)
    best = 1
    for d in range(1, n128 + 1):
        if n128 % d == 0 and d <= budget_128:
            best = d
    chunk = best * 128
    if n128 > budget_128 and best * 4 <= budget_128:
        # Poor divisor structure (e.g. prime n128): prefer one big non-dividing
        # chunk plus a padded tail over many tiny grid steps.
        chunk = budget_128 * 128
    n_chunks = -(-HW // chunk)
    HWp = n_chunks * chunk

    # Zero-pad the spatial slab if HW is not a multiple of the chunk; the
    # zeros do not perturb the pooled sums (mean divides by the true HW).
    x3p = x3 if HWp == HW else jnp.pad(x3, ((0, 0), (0, 0), (0, HWp - HW)))

    # C-block the pool pass so both v7x TensorCores stay busy when B == 1.
    if B == 1 and C % 16 == 0:
        n_cb, Cb = 2, C // 2
    else:
        n_cb, Cb = 1, C

    pool_block_bytes = Cb * chunk * dtype_bytes
    pool_vmem = int(min(max(4 * pool_block_bytes + (4 << 20), 16 << 20),
                        vmem_cap))
    sums = pl.pallas_call(
        _eca_pool_kernel,
        out_shape=jax.ShapeDtypeStruct((B, C, 1), jnp.float32),
        grid=(B, n_cb, n_chunks),
        in_specs=[pl.BlockSpec((1, Cb, chunk), lambda b, cb, j: (b, cb, j))],
        out_specs=pl.BlockSpec((1, Cb, 1), lambda b, cb, j: (b, cb, 0)),
        compiler_params=pltpu.CompilerParams(
            dimension_semantics=("parallel", "parallel", "arbitrary"),
            vmem_limit_bytes=pool_vmem),
    )(x3p)

    # Tiny 3-tap channel conv + sigmoid on the (B, C) pooled means.  Done in
    # plain JAX (O(B*C) work, negligible) so the pool pass can be C-blocked:
    # the conv couples neighbouring channels across C-blocks.
    y = sums[:, :, 0] * jnp.float32(1.0 / HW)                       # (B, C)
    yp = jnp.pad(y, ((0, 0), (1, 1)))
    z = w32[0] * yp[:, 0:C] + w32[1] * yp[:, 1:C + 1] + w32[2] * yp[:, 2:C + 2]
    gates = jax.nn.sigmoid(z)[:, :, None]                           # (B, C, 1)

    scale_block_bytes = C * chunk * dtype_bytes
    scale_vmem = int(min(max(4 * scale_block_bytes + (4 << 20), 16 << 20),
                         vmem_cap))
    out3 = pl.pallas_call(
        _eca_scale_kernel,
        out_shape=jax.ShapeDtypeStruct((B, C, HWp), x.dtype),
        grid=(B, n_chunks),
        in_specs=[
            pl.BlockSpec((1, C, chunk), lambda b, j: (b, 0, j)),     # x
            pl.BlockSpec((1, C, 1), lambda b, j: (b, 0, 0)),         # gates
        ],
        out_specs=pl.BlockSpec((1, C, chunk), lambda b, j: (b, 0, j)),
        compiler_params=pltpu.CompilerParams(
            dimension_semantics=("parallel", "parallel"),
            vmem_limit_bytes=scale_vmem),
        input_output_aliases={0: 0} if donate_input else {},
    )(x3p, gates)

    if HWp != HW:
        out3 = out3[:, :, :HW]
    return out3.reshape(B, C, H, W)


# ---------------------------------------------------------------------------
# Plain-JAX reference mirroring the PyTorch forward.
# ---------------------------------------------------------------------------
def eca_reference(x, conv_weight):
    xf = x.astype(jnp.float32)
    y = jnp.mean(xf, axis=(2, 3))                                   # (B, C)
    yp = jnp.pad(y, ((0, 0), (1, 1)))                               # (B, C+2)
    C = y.shape[1]
    z = (conv_weight[0] * yp[:, 0:C]
         + conv_weight[1] * yp[:, 1:C + 1]
         + conv_weight[2] * yp[:, 2:C + 2])
    s = jax.nn.sigmoid(z)
    return (xf * s[:, :, None, None]).astype(x.dtype)


if __name__ == "__main__":
    key = jax.random.PRNGKey(0)
    kx, kw, kx1, kx2 = jax.random.split(key, 4)

    # Conv1d(1, 1, k=3, bias=False) taps (PyTorch default fan-in init range).
    k_size = 3
    bound = 1.0 / np.sqrt(k_size)
    conv_w = jax.random.uniform(kw, (k_size,), minval=-bound, maxval=bound,
                                dtype=jnp.float32)

    # --- 1) fused path, B > 1 (double-buffered) ----------------------------
    B, C, H, W = 2, 4, 16, 16
    x = jax.random.normal(kx, (B, C, H, W), dtype=jnp.float32)
    ref = eca_reference(x, conv_w)
    out = jax.block_until_ready(eca_layer(x, conv_w))
    np.testing.assert_allclose(np.asarray(out), np.asarray(ref),
                               rtol=1e-5, atol=1e-5)

    # --- 2) fused path, B == 1 (single-buffered, pl.Buffered(1)) ------------
    x1 = jax.random.normal(kx1, (1, 8, 16, 16), dtype=jnp.float32)
    ref1 = eca_reference(x1, conv_w)
    out1 = jax.block_until_ready(eca_layer(x1, conv_w))
    np.testing.assert_allclose(np.asarray(out1), np.asarray(ref1),
                               rtol=1e-5, atol=1e-5)

    # --- 3) two-pass path forced at small shapes (chunked accumulation) ----
    out_split = jax.block_until_ready(
        eca_layer(x, conv_w, max_fused_slab_bytes=0, _max_chunk_bytes=1))
    np.testing.assert_allclose(np.asarray(out_split), np.asarray(ref),
                               rtol=1e-5, atol=1e-5)

    # --- 4) two-pass path with HW % 128 != 0 (padding) and B==1 C-blocking --
    x2 = jax.random.normal(kx2, (1, 16, 10, 10), dtype=jnp.float32)
    ref2 = eca_reference(x2, conv_w)
    out2 = jax.block_until_ready(
        eca_layer(x2, conv_w, max_fused_slab_bytes=0))
    np.testing.assert_allclose(np.asarray(out2), np.asarray(ref2),
                               rtol=1e-5, atol=1e-5)

    print("KERNEL_OK")
</pallas_src>

<mosaic_0001>
module attributes {stable_mosaic.version = 11 : i64} {
  func.func @_eca_fused_kernel(%arg0: i32, %arg1: memref<4xf32, #tpu.memory_space<smem>>, %arg2: memref<1x4x256xf32, #tpu.memory_space<vmem>>, %arg3: memref<1x4x256xf32, #tpu.memory_space<vmem>>) attributes {dimension_semantics = [#tpu.dimension_semantics<parallel>], iteration_bounds = array<i64: 2>, scalar_prefetch = 0 : i64, scratch_operands = 0 : i64, tpu.core_type = #tpu.core_type<tc>, window_params = [{transform_indices = @transform_0, window_bounds = array<i64: 4>}, {transform_indices = @transform_1, window_bounds = array<i64: 1, 4, 256>}, {transform_indices = @transform_2, window_bounds = array<i64: 1, 4, 256>}]} {
    %c0 = arith.constant 0 : index
    %0 = memref.load %arg1[%c0] : memref<4xf32, #tpu.memory_space<smem>>
    %c1 = arith.constant 1 : index
    %1 = memref.load %arg1[%c1] : memref<4xf32, #tpu.memory_space<smem>>
    %c2 = arith.constant 2 : index
    %2 = memref.load %arg1[%c2] : memref<4xf32, #tpu.memory_space<smem>>
    %c3 = arith.constant 3 : index
    %3 = memref.load %arg1[%c3] : memref<4xf32, #tpu.memory_space<smem>>
    %c0_0 = arith.constant 0 : index
    %c0_1 = arith.constant 0 : index
    %c0_2 = arith.constant 0 : index
    %4 = vector.load %arg2[%c0_0, %c0_1, %c0_2] : memref<1x4x256xf32, #tpu.memory_space<vmem>>, vector<1x4x256xf32>
    %cst = arith.constant dense<0.000000e+00> : vector<1x4xf32>
    %5 = vector.multi_reduction <add>, %4, %cst [2] : vector<1x4x256xf32> to vector<1x4xf32>
    %6 = vector.broadcast %3 : f32 to vector<1x4xf32>
    %7 = arith.mulf %5, %6 : vector<1x4xf32>
    %8 = tpu.iota {dimensions = array<i32: 1>} : vector<1x4xi32>
    %c0_i32 = arith.constant 0 : i32
    %9 = vector.broadcast %c0_i32 : i32 to vector<1x4xi32>
    %10 = arith.cmpi eq, %8, %9 : vector<1x4xi32>
    %c1_i32 = arith.constant 1 : i32
    %11 = tpu.dynamic_rotate %7 by %c1_i32 dim 1 : vector<1x4xf32>, i32 -> vector<1x4xf32>
    %cst_3 = arith.constant 0.000000e+00 : f32
    %12 = vector.broadcast %cst_3 : f32 to vector<1x4xf32>
    %13 = arith.select %10, %12, %11 : vector<1x4xi1>, vector<1x4xf32>
    %c3_i32 = arith.constant 3 : i32
    %14 = vector.broadcast %c3_i32 : i32 to vector<1x4xi32>
    %15 = arith.cmpi eq, %8, %14 : vector<1x4xi32>
    %c3_i32_4 = arith.constant 3 : i32
    %16 = tpu.dynamic_rotate %7 by %c3_i32_4 dim 1 : vector<1x4xf32>, i32 -> vector<1x4xf32>
    %cst_5 = arith.constant 0.000000e+00 : f32
    %17 = vector.broadcast %cst_5 : f32 to vector<1x4xf32>
    %18 = arith.select %15, %17, %16 : vector<1x4xi1>, vector<1x4xf32>
    %19 = vector.broadcast %0 : f32 to vector<1x4xf32>
    %20 = arith.mulf %19, %13 : vector<1x4xf32>
    %21 = vector.broadcast %1 : f32 to vector<1x4xf32>
    %22 = arith.mulf %21, %7 : vector<1x4xf32>
    %23 = arith.addf %20, %22 : vector<1x4xf32>
    %24 = vector.broadcast %2 : f32 to vector<1x4xf32>
    %25 = arith.mulf %24, %18 : vector<1x4xf32>
    %26 = arith.addf %23, %25 : vector<1x4xf32>
    %27 = arith.negf %26 : vector<1x4xf32>
    %28 = math.exp %27 : vector<1x4xf32>
    %cst_6 = arith.constant 1.000000e+00 : f32
    %29 = vector.broadcast %cst_6 : f32 to vector<1x4xf32>
    %30 = arith.addf %29, %28 : vector<1x4xf32>
    %31 = arith.divf %29, %30 : vector<1x4xf32>
    %c0_7 = arith.constant 0 : index
    %c0_8 = arith.constant 0 : index
    %c0_9 = arith.constant 0 : index
    %32 = vector.load %arg2[%c0_7, %c0_8, %c0_9] : memref<1x4x256xf32, #tpu.memory_space<vmem>>, vector<1x4x256xf32>
    %33 = vector.shape_cast %31 : vector<1x4xf32> to vector<1x4x1xf32>
    %34 = vector.broadcast %33 : vector<1x4x1xf32> to vector<1x4x256xf32>
    %35 = arith.mulf %32, %34 : vector<1x4x256xf32>
    %c0_10 = arith.constant 0 : index
    %c0_11 = arith.constant 0 : index
    %c0_12 = arith.constant 0 : index
    %36 = vector.load %arg3[%c0_10, %c0_11, %c0_12] : memref<1x4x256xf32, #tpu.memory_space<vmem>>, vector<1x4x256xf32>
    tpu.vector_store %arg3[%c0_10, %c0_11, %c0_12], %35 {strides = array<i32>} : memref<1x4x256xf32, #tpu.memory_space<vmem>>, vector<1x4x256xf32>,
    return
  }
  func.func @transform_0(%arg0: i32) -> i32 {
    %c0_i32 = arith.constant 0 : i32
    %c0_i32_0 = arith.constant 0 : i32
    return %c0_i32 : i32
  }
  func.func @transform_1(%arg0: i32) -> (i32, i32, i32) {
    %c0_i32 = arith.constant 0 : i32
    %c0_i32_0 = arith.constant 0 : i32
    %c0_i32_1 = arith.constant 0 : i32
    return %arg0, %c0_i32, %c0_i32_0 : i32, i32, i32
  }
  func.func @transform_2(%arg0: i32) -> (i32, i32, i32) {
    %c0_i32 = arith.constant 0 : i32
    %c0_i32_0 = arith.constant 0 : i32
    %c0_i32_1 = arith.constant 0 : i32
    return %arg0, %c0_i32, %c0_i32_0 : i32, i32, i32
  }
}

</mosaic_0001>

<bundles_post_ra>
// kernel: tpu_custom_call.1
= control target key start
LH: loop header
LB: loop body
LE: loop exit
PB: predicated region body
PF: predicated region fallthrough
CT: control target
= control target key end

     0   :  { %7 = vsyncpa [#allocation5], 0  ;;  %s724_s0 = inlined_call_operand.hbm [shape: f32[4], index: 0, kind: input, shape index: {}]   ;;  %s725_s1 = inlined_call_operand.hbm [shape: f32[2,4,256], index: 1, kind: input, shape index: {}]   ;;  %s726_s2 = inlined_call_operand.hbm [shape: f32[2,4,256], index: 2, kind: output, shape index: {}]  }
   0x1   :  { %8 = vsyncpa [#allocation3], 0 }
   0x2   :  { %10 = vsyncpa [#allocation3 + $0x1], 0 }
   0x3   :  { %11 = vsyncpa [#allocation4], 0 }
   0x4   :  { %13 = vsyncpa [#allocation4 + $0x1], 0  ;;  %s568_s9 = smov 0   ;;  %s570_s10 = smov 0  }
   0x5   :  { %s572_s11 = smov 0   ;;  %s574_s12 = smov 0  }
   0x6 LB: > { %s589_s13 = sadd.s32 4294967295, %s544_s12   ;;  %s349_s14 = sadd.s32 4294967294, %s544_s12   ;;  %s544_s12 = sphi %s574_s12, %s746_s12   ;;  %s540_s11 = sphi %s572_s11, %s745_s11   ;;  %s536_s10 = sphi %s570_s10, %s744_s10   ;;  %s532_s9 = sphi %s568_s9, %s743_s9  }
   0x7   : > { %p60_p0 = scmp.ne.s32.totalorder %s536_s10, %s532_s9  ;;  %p727_p1 = scmp.eq.s32.totalorder %s589_s13, 0 }
   0x8   : > { %p84_p2 = scmp.eq.s32.totalorder %s589_s13, 1  ;;  %p90_p3 = scmp.eq.s32.totalorder %s349_s14, 1 }
   0x9   : > { %p598_p4 = por %p727_p1, %p60_p0  ;;  %p350_p5 = scmp.ge.s32.totalorder %s544_s12, 1 }
   0xa   : > { %p603_p6 = por %p90_p3, %p60_p0  ;;  %p97_p7 = scmp.lt.s32.totalorder %s544_s12, 3 }
   0xb   : > { %s731_s15 = scalar_select %p598_p4, 1, 0 }
   0xc   : > { %s732_s16 = scalar_select %p603_p6, 1, 0 }
   0xd   : > { %p608_p8 = pnand %p350_p5, %p97_p7  ;;  %s614_s18 = sadd.s32 1, %s544_s12  }
   0xe   : > { %s44_s19 = ssub.s32 %s544_s12, %s614_s18  ;;  %s47_s20 = sadd.s32 1, %s540_s11 }
   0xf   : > { %s733_s17 = scalar_select %p608_p8, 1, 0 }
  0x10   : > { %p379_p10 = pneg %p608_p8  ;;  %p45_p12 = scmp.eq.s32.totalorder %s44_s19, 0 }
  0x11   : > { %p54_p13 = scmp.ne.s32.totalorder %s540_s11, %s536_s10  ;;  %p55_p0 = scmp.eq.s32.totalorder %s544_s12, 0 }
  0x12   : > { %p380_p11 = pnand %p379_p10, %p727_p1  ;;  %p392_p3 = scmp.lt.s32.totalorder %s544_s12, 2 }
  0x13   : > { %s546_s21 = smov [#allocation2]   ;;  %p56_p5 = por %p55_p0, %p54_p13 }
  0x14   : > { %382 = dma.hbm_to_smem (!%p380_p11), %s724_s0, 16, %s546_s21, [#allocation5]  }
  0x15   : > { %s631_s24 = scalar_select %p45_p12, %s540_s11, %s47_s20  }
  0x16   : > { %p635_p7 = por %p84_p2, %p54_p13  ;;  %s119_s26 = sand.u32 1, %s540_s11  }
  0x17   : > { %s369_s27 = sshll.u32 %s544_s12, 7  ;;  %s353_s28 = sshll.u32 %s119_s26, 3 }
  0x18   : > { %s734_s25 = scalar_select %p635_p7, 1, 0 }
  0x19   : > { %s644_s3 = scalar_lea.hbm %s725_s1, %s369_s27  ;;  %s123_s4 = scalar_lea.vmem [#allocation6], %s353_s28 }
  0x1a   : > { %s131_s5 = sshll.u32 %s123_s4, 4  ;;  %p646_p10 = pnand %p392_p3, %p56_p5  ;;  %s132_s5 = int_to_ptr.vmem [resolvable:$true] %s131_s5 }
  0x1b   : > { %s120_s7 = scalar_lea.sflag [#allocation3], %s119_s26  ;;  %s448_s8 = scalar_lea.hbm %s644_s3, 128 }
  0x1c   : > { %p449_p2 = scmp.ne.s32.totalorder %s644_s3, %s448_s8  ;;  %p450_p11 = pneg %p646_p10 }
  0x1d   : > { %s453_s20 = scalar_lea.hbm %s725_s1, 256  ;;  %p454_p0 = scmp.lt.s32.totalorder %s644_s3, %s725_s1 }
  0x1e   : > { %p451_p12 = pnand %p450_p11, %p449_p2  ;;  %p455_p3 = scmp.lt.s32.totalorder %s453_s20, %s448_s8 }
  0x20   : > { %p452_p13 = pneg %p451_p12  ;;  %p456_p5 = por %p455_p3, %p454_p0 }
  0x22   : > { %p457_p9 = pnand %p456_p5, %p452_p13 }
  0x24   : > { %460 = shalt.err (!%p457_p9)
}
  0x25   : > { %s461_s23 = scalar_lea.vmem %s132_s5, 128  ;;  %s547_s26 = smov [#allocation6]  }
  0x26   : > { %p462_p1 = scmp.ne.s32.totalorder %s132_s5, %s461_s23  ;;  %s466_s27 = sshll.u32 %s547_s26, 4  ;;  %s467_s27 = int_to_ptr.vmem [resolvable:$false] %s466_s27 }
  0x27   : > { %s468_s28 = scalar_lea.vmem %s467_s27, 256  ;;  %p469_p2 = scmp.lt.s32.totalorder %s132_s5, %s467_s27 }
  0x28   : > { %p464_p6 = pnand %p462_p1, %p450_p11  ;;  %p470_p12 = scmp.lt.s32.totalorder %s468_s28, %s461_s23 }
  0x2a   : > { %p465_p7 = pneg %p464_p6  ;;  %p471_p4 = por %p470_p12, %p469_p2 }
  0x2c   : > { %p472_p8 = pnand %p471_p4, %p465_p7 }
  0x2e   : > { %475 = shalt.err (!%p472_p8)
}
  0x2f   : > { %386 = dma.hbm_to_vmem [thread:$0]  (!%p646_p10), %s644_s3, 128, %s132_s5, %s120_s7  }
  0x30   : > { %p736_p13 = scmp.ne.s32.totalorder %s733_s17, 0 }
  0x31   : > { %p737_p9 = scmp.eq.s32.totalorder (!%p736_p13), %s589_s13, 0 }
  0x32   : > { %140 = sbr.rel (%p736_p13) target bundleno = 732 (0x2dc), region = 28 }
  0x37   : > { %519 = dma.done.wait (%p737_p9), [#allocation5], 16   ;;  %p738_p1 = pmov %p737_p9 }
  0x38   : > { %s671_s29 = sand.u32 1, %s536_s10   ;;  %p739_p4 = scmp.ne.s32.totalorder %s731_s15, 0 }
  0x39   : > { %521 = vsyncadd (%p738_p1), [#allocation5], 4294967280  ;;  %s358_s30 = sshll.u32 %s671_s29, 3  ;;  %s147_s4 = scalar_lea.sflag [#allocation3], %s671_s29 }
  0x3a   : > { %s150_s3 = scalar_lea.vmem [#allocation6], %s358_s30 }
  0x3b   : > { %523 = dma.done.wait (%p739_p4), %s147_s4, 128  }
  0x3c   : > { %525 = vsyncadd (%p739_p4), %s147_s4, 4294967168 }
  0x3d   : > { %155 = sfence }
  0x3e   : > { %v681_v0 = vld [vmem:[%s150_s3] sm:$0xff]  ;;  %vm180_vm0 = vcmask 1043456   ;;  %s362_s17 = sld [smem:[#allocation2 + $0x3]]  ;;  %v188_v5 = vlaneseq  ;;  %s548_s15 = smov 4   ;;  %vm197_vm1 = vcmask 1047584  }
  0x3f   : > { %v178_v1 = vcombine.high %v681_v0, %v681_v0  ;;  %v181_v2 = vsel %vm180_vm0, %v681_v0, 0.0  ;;  %s360_s5 = sld [smem:[#allocation2 + $0x1]]  ;;  %s549_s6 = smov 125   ;;  %v551_v36 = vmov 839922192  }
  0x40   : > { %v189_v6 = vand.u32 127, %v188_v5  ;;  %v193_v7 = vshrl.u32 %v188_v5, 7  ;;  %s550_s7 = smov 127   ;;  %s172_s8 = sld [smem:[#allocation2]]  ;;  %v243_v37 = vunpack.c.l.s4 %v551_v36 }
  0x41   : > { %v182_v3 = vsel %vm180_vm0, %v178_v1, 0.0  ;;  %s361_s14 = sld [smem:[#allocation2 + $0x2]]  ;;  %s370_s19 = sshll.u32 %s589_s13, 7 }
  0x42   : > { %v183_v4 = vadd.f32 %v182_v3, %v181_v2  ;;  %v194_v9 = vsub.s32 %v189_v6, %v193_v7  ;;  %vm190_vm2 = vcmp.eq.s32.totalorder %v189_v6, 0  ;;  %vm209_vm3 = vcmp.eq.s32.totalorder %v189_v6, 3  ;;  %s171_s20 = scalar_lea.vmem [#allocation7], %s358_s30  ;;  %s265_s26 = scalar_lea.hbm %s726_s2, %s370_s19 }
  0x43   : > { %v236_v33 = vsub.s32 0, %v193_v7  ;;  %v244_v38 = vunpack.c.0.s8 %v243_v37  ;;  %s267_s21 = sshll.u32 %s171_s20, 4  ;;  %s253_s27 = scalar_lea.sflag [#allocation4], %s671_s29  ;;  %s268_s21 = int_to_ptr.vmem [resolvable:$true] %s267_s21 }
  0x44   : > { %184 = vadd.xlane.f32.xlu0 %v183_v4  ;;  %v186_v8 = vstv %s362_s17  ;;  %s476_s28 = scalar_lea.vmem %s268_s21, 128  ;;  %p740_p8 = scmp.ne.s32.totalorder %s734_s25, 0 }
  0x45   : > { %v216_v11 = vstv %s360_s5  ;;  %v247_v39 = vsub.s32 %v244_v38, %v193_v7  ;;  %p477_p6 = scmp.ne.s32.totalorder %s268_s21, %s476_s28  ;;  %s552_s4 = smov [#allocation7]  }
  0x46   : > { %v214_v20 = vstv %s172_s8  ;;  %s480_s13 = sshll.u32 %s552_s4, 4  ;;  %s481_s13 = int_to_ptr.vmem [resolvable:$false] %s480_s13 }
  0x47   : > { %v225_v24 = vstv %s361_s14  ;;  %p478_p7 = pnand %p477_p6, %p740_p8  ;;  %s482_s30 = scalar_lea.vmem %s481_s13, 256 }
  0x48   : > { %p483_p11 = scmp.lt.s32.totalorder %s268_s21, %s481_s13  ;;  %p484_p0 = scmp.lt.s32.totalorder %s482_s30, %s476_s28 }
  0x49   : > { %p479_p10 = pneg %p478_p7 }
  0x4a   : > { %p485_p3 = por %p484_p0, %p483_p11 }
  0x4c   : > { %p486_p5 = pnand %p485_p3, %p479_p10 }
  0xcd   : > { %v185_v10 = vpop.xlane.xlu0 %184 }
  0xce   : > { %v187_v12 = vmul.f32 %v186_v8, %v185_v10 }
  0xd0   : > { %v195_v13 = vrot.slane %v187_v12, %v194_v9  ;;  %v217_v14 = vmul.f32 %v216_v11, %v187_v12 }
  0xd2   : > { %v222_v15 = vrot.slane %v217_v14, %v194_v9  ;;  %198 = vrot.lane.b32.xlu0 %v195_v13, %s548_s15 }
 0x144   : > { %v199_v16 = vpop.permute.xlu0 %198 }
 0x145   : > { %v200_v17 = vsel %vm197_vm1, %v199_v16, %v195_v13 }
 0x146   : > { %201 = vrot.lane.b32.xlu1 %v200_v17, %s548_s15 }
 0x1b8   : > { %v202_v18 = vpop.permute.xlu1 %201 }
 0x1b9   : > { %v203_v19 = vsel %vm197_vm1, %v202_v18, %v195_v13 }
 0x1ba   : > { %205 = vrot.lane.b32.xlu1 %v203_v19, %s549_s6 }
 0x1be   : > { %210 = vrot.lane.b32.xlu1 %v203_v19, %s550_s7 }
 0x22c   : > { %v206_v21 = vpop.permute.xlu1 %205 }
 0x22d   : > { %v208_v22 = vsel %vm190_vm2, 0.0, %v206_v21 }
 0x22e   : > { %v215_v23 = vmul.f32 %v214_v20, %v208_v22 }
 0x230   : > { %v211_v25 = vpop.permute.xlu1 %210  ;;  %v224_v27 = vadd.f32 %v222_v15, %v215_v23 }
 0x231   : > { %v213_v26 = vsel %vm209_vm3, 0.0, %v211_v25 }
 0x232   : > { %v226_v28 = vmul.f32 %v225_v24, %v213_v26 }
 0x234   : > { %v227_v29 = vadd.f32 %v226_v28, %v224_v27 }
 0x236   : > { %v363_v30 = vmul.f32 -1.442695, %v227_v29 }
 0x238   : > { %433 = vpow2.f32 %v363_v30 }
 0x245   : > { %v434_v31 = vpop.eup %433 }
 0x246   : > { %v231_v32 = vadd.f32 1.0, %v434_v31 }
 0x248   : > { %435 = vrcp.f32 %v231_v32 }
 0x255   : > { %v436_v34 = vpop.eup %435 }
 0x256   : > { %v237_v35 = vrot.slane %v436_v34, %v236_v33 }
 0x258   : > { %239 = vbcast.lane.b32.xlu1 %v237_v35, 256 }
 0x2ca   : > { %v240_v40 = vpop.permute.xlu1 %239 }
 0x2cb   : > { %v248_v41 = vrot.slane %v240_v40, %v247_v39 }
 0x2cd   : > { %v250_v42 = vmul.f32 %v248_v41, %v681_v0 }
 0x2cf   : > { %251 = vst [vmem:[%s171_s20] sm:$0xff] %v250_v42 }
 0x2d0   : > { %489 = shalt.err (!%p486_p5)
}
 0x2d1   : > { %s490_s3 = scalar_lea.hbm %s265_s26, 128  ;;  %s494_s5 = scalar_lea.hbm %s726_s2, 256 }
 0x2d2   : > { %p491_p2 = scmp.ne.s32.totalorder %s265_s26, %s490_s3  ;;  %p495_p9 = scmp.lt.s32.totalorder %s265_s26, %s726_s2 }
 0x2d3   : > { %p496_p1 = scmp.lt.s32.totalorder %s494_s5, %s490_s3 }
 0x2d4   : > { %p492_p12 = pnand %p491_p2, %p740_p8 }
 0x2d5   : > { %p497_p4 = por %p496_p1, %p495_p9 }
 0x2d6   : > { %p493_p13 = pneg %p492_p12 }
 0x2d8   : > { %p498_p6 = pnand %p497_p4, %p493_p13 }
 0x2da   : > { %501 = shalt.err (!%p498_p6)
}
 0x2db   : > { %377 = dma.vmem_to_hbm [thread:$0]  (%p740_p8), %s268_s21, 128, %s265_s26, %s253_s27  }
 0x2dc PF: > { %s279_s7 = sand.u32 1, %s532_s9   ;;  %p741_p7 = scmp.ne.s32.totalorder %s732_s16, 0 }
 0x2dd   : > { %p742_p10 = scmp.ge.s32.totalorder %s544_s12, 2  ;;  %s280_s8 = scalar_lea.sflag [#allocation4], %s279_s7 }
 0x2df   : > { %p388_p11 = pnand %p742_p10, %p741_p7 }
 0x2e1   : > { %p389_p0 = pneg %p388_p11 }
 0x2e3   : > { %527 = dma.done.wait (%p389_p0), %s280_s8, 128  }
 0x2e4   : > { %529 = vsyncadd (%p389_p0), %s280_s8, 4294967168  ;;  %p16_p3 = scmp.ge.s32.totalorder %s614_s18, 4   ;;  %s743_s9 = smov %s536_s10 }
 0x2e5   : > { %s744_s10 = smov %s540_s11  ;;  %s745_s11 = smov %s631_s24 }
 0x2e6   : > { %s746_s12 = smov %s614_s18  ;;  %18 = sbr.rel (!%p16_p3) target bundleno = 6 (0x6), region = 78 }
 0x2eb   :  { %285 = vsyncpa [#allocation3], 1 }
 0x2ec   :  { %287 = vsyncpa [#allocation3 + $0x1], 1 }
 0x2ed   :  { %288 = vsyncpa [#allocation4], 1 }
 0x2ee   :  { %290 = vsyncpa [#allocation4 + $0x1], 1 }
 0x2ef   :  { %291 = vsyncpa [#allocation5], 1 }
 0x2f0   :  { %293 = vsyncpa [#allocation5 + $0x1], 1 }

</bundles_post_ra>
